<compile_context>
chip_gen: v6e
topology: v6e:2x2x1
jax: 0.10.0
libtpu: 0.0.40
codegen_flags: <defaults>
</compile_context>

<pallas_src>
import functools
import math

import jax
import jax.numpy as jnp
from jax.experimental import pallas as pl
from jax.experimental.pallas import tpu as pltpu


def _round_up(x, m):
    return ((x + m - 1) // m) * m


def _flatten_rows(x):
    dim = x.shape[-1]
    rows = math.prod(x.shape[:-1]) if x.ndim > 1 else 1
    return x.reshape(rows, dim), rows, dim


def _pick_row_tile(rows, dtype, row_tile):
    # sublane granularity: 8 rows for 32-bit, 16 for bf16 inputs.
    sub = 16 if dtype == jnp.bfloat16 else 8
    tm = min(row_tile, _round_up(rows, sub))
    tm = _round_up(tm, sub)
    rows_p = _round_up(rows, tm)
    return tm, rows_p


# --------------------- Fused LayerNorm + Linear kernel -----------------------

def _prenorm_linear_kernel(x_ref, g_ref, b_ref, w_ref, bias_ref, o_ref, *, eps):
    # Single f32 upcast per tile; LN math entirely in f32.
    x = x_ref[...].astype(jnp.float32)                       # (tm, dim_in)
    mean = jnp.mean(x, axis=-1, keepdims=True)                # one XLU reduce
    mean_sq = jnp.mean(x * x, axis=-1, keepdims=True)         # second reduce (single pass)
    var = mean_sq - mean * mean
    xhat = (x - mean) * jax.lax.rsqrt(var + eps)
    h = xhat * g_ref[...].astype(jnp.float32) + b_ref[...].astype(jnp.float32)

    # Contract against the weight's native PyTorch layout (dim_out, dim_in):
    # (tm, K) x (N, K) -> (tm, N)  (MXU matmul with transposed RHS).
    acc = jax.lax.dot_general(
        h.astype(w_ref.dtype), w_ref[...],
        dimension_numbers=(((1,), (1,)), ((), ())),
        preferred_element_type=jnp.float32)
    o_ref[...] = (acc + bias_ref[...].astype(jnp.float32)).astype(o_ref.dtype)


def prenorm_linear_pallas(x, gamma, beta, weight, bias, *, eps=1e-5,
                          row_tile=256):
    """Fused PreNorm(dim, Linear)(x): Linear(LayerNorm(x)).

    x: [..., dim_in]; weight: (dim_out, dim_in) PyTorch layout; bias: (dim_out,).
    """
    orig_shape = x.shape
    x2, rows, dim_in = _flatten_rows(x)
    dim_out = weight.shape[0]

    tm, rows_p = _pick_row_tile(rows, x.dtype, row_tile)
    if rows_p != rows:
        # Ragged tail: pad rows (padded rows normalize to 0 and are sliced off).
        x2 = jnp.pad(x2, ((0, rows_p - rows), (0, 0)))

    g2 = gamma.reshape(1, dim_in)
    b2 = beta.reshape(1, dim_in)
    bias2 = bias.reshape(1, dim_out)

    out = pl.pallas_call(
        functools.partial(_prenorm_linear_kernel, eps=eps),
        out_shape=jax.ShapeDtypeStruct((rows_p, dim_out), x.dtype),
        grid_spec=pltpu.PrefetchScalarGridSpec(
            num_scalar_prefetch=0,
            grid=(rows_p // tm,),
            in_specs=[
                pl.BlockSpec((tm, dim_in), lambda i: (i, 0)),       # x tile
                pl.BlockSpec((1, dim_in), lambda i: (0, 0)),        # gamma
                pl.BlockSpec((1, dim_in), lambda i: (0, 0)),        # beta
                pl.BlockSpec((dim_out, dim_in), lambda i: (0, 0)),  # weight (resident)
                pl.BlockSpec((1, dim_out), lambda i: (0, 0)),       # bias
            ],
            out_specs=pl.BlockSpec((tm, dim_out), lambda i: (i, 0)),
        ),
        compiler_params=pltpu.CompilerParams(
            dimension_semantics=("parallel",),       # shard rows across TCs (v7x megacore)
            vmem_limit_bytes=32 * 1024 * 1024,       # safe on v5e/v6e/v7x
        ),
    )(x2, g2, b2, weight, bias2)

    if rows_p != rows:
        out = out[:rows]
    return out.reshape(orig_shape[:-1] + (dim_out,))


# ------------------- Standalone LayerNorm (for arbitrary fn) -----------------

def _layernorm_kernel(x_ref, g_ref, b_ref, o_ref, *, eps):
    x = x_ref[...].astype(jnp.float32)                       # (tm, dim)
    mean = jnp.mean(x, axis=-1, keepdims=True)
    mean_sq = jnp.mean(x * x, axis=-1, keepdims=True)
    var = mean_sq - mean * mean
    xhat = (x - mean) * jax.lax.rsqrt(var + eps)
    y = xhat * g_ref[...].astype(jnp.float32) + b_ref[...].astype(jnp.float32)
    o_ref[...] = y.astype(o_ref.dtype)


def layernorm_pallas(x, gamma, beta, *, eps=1e-5, row_tile=256):
    """LayerNorm over the last axis of x (any leading dims)."""
    orig_shape = x.shape
    x2, rows, dim = _flatten_rows(x)

    tm, rows_p = _pick_row_tile(rows, x.dtype, row_tile)
    if rows_p != rows:
        x2 = jnp.pad(x2, ((0, rows_p - rows), (0, 0)))

    g2 = gamma.reshape(1, dim)
    b2 = beta.reshape(1, dim)

    out = pl.pallas_call(
        functools.partial(_layernorm_kernel, eps=eps),
        out_shape=jax.ShapeDtypeStruct((rows_p, dim), x.dtype),
        grid_spec=pltpu.PrefetchScalarGridSpec(
            num_scalar_prefetch=0,
            grid=(rows_p // tm,),
            in_specs=[
                pl.BlockSpec((tm, dim), lambda i: (i, 0)),
                pl.BlockSpec((1, dim), lambda i: (0, 0)),
                pl.BlockSpec((1, dim), lambda i: (0, 0)),
            ],
            out_specs=pl.BlockSpec((tm, dim), lambda i: (i, 0)),
        ),
        compiler_params=pltpu.CompilerParams(
            dimension_semantics=("parallel",),
            vmem_limit_bytes=32 * 1024 * 1024,
        ),
    )(x2, g2, b2)

    if rows_p != rows:
        out = out[:rows]
    return out.reshape(orig_shape)


def prenorm(x, gamma, beta, fn, **kwargs):
    """Exact PreNorm.forward semantics for an arbitrary wrapped fn."""
    return fn(layernorm_pallas(x, gamma, beta), **kwargs)


# ------------------------------------ demo -----------------------------------

if __name__ == "__main__":
    batch, seq, dim = 2, 8, 32
    # NOTE: dim=32 is a toy size (real model dims >= 128 fill the lane width).

    key = jax.random.PRNGKey(0)
    kx, kw, kb = jax.random.split(key, 3)

    x = jax.random.normal(kx, (batch, seq, dim), dtype=jnp.float32)

    # nn.LayerNorm(dim) default init: weight = 1, bias = 0 (deterministic).
    gamma = jnp.ones((dim,), dtype=jnp.float32)
    beta = jnp.zeros((dim,), dtype=jnp.float32)

    # The wrapped `fn`: a Linear(dim, dim) with deterministic random params.
    w = jax.random.normal(kw, (dim, dim), dtype=jnp.float32) * 0.05
    b = jax.random.normal(kb, (dim,), dtype=jnp.float32) * 0.05

    # Fused hot path: PreNorm(dim, Linear) in a single Pallas kernel.
    out = prenorm_linear_pallas(x, gamma, beta, w, b)
    out = jax.block_until_ready(out)

    # Generic path (arbitrary fn) still works: LN kernel + plain-JAX fn.
    out_generic = prenorm(x, gamma, beta, lambda h: h @ w.T + b)
    out_generic = jax.block_until_ready(out_generic)

    # Reference check in plain JAX (LayerNorm + Linear).
    mean = jnp.mean(x, axis=-1, keepdims=True)
    var = jnp.mean((x - mean) ** 2, axis=-1, keepdims=True)
    ref = (x - mean) / jnp.sqrt(var + 1e-5) * gamma + beta
    ref = ref @ w.T + b

    assert out.shape == (batch, seq, dim)
    assert jnp.allclose(out, ref, atol=1e-4, rtol=1e-4)
    assert jnp.allclose(out_generic, ref, atol=1e-4, rtol=1e-4)

    print("KERNEL_OK")
</pallas_src>

<mosaic_0001>
module attributes {stable_mosaic.version = 11 : i64} {
  func.func @_prenorm_linear_kernel(%arg0: i32, %arg1: memref<16x32xf32, #tpu.memory_space<vmem>>, %arg2: memref<1x32xf32, #tpu.memory_space<vmem>>, %arg3: memref<1x32xf32, #tpu.memory_space<vmem>>, %arg4: memref<32x32xf32, #tpu.memory_space<vmem>>, %arg5: memref<1x32xf32, #tpu.memory_space<vmem>>, %arg6: memref<16x32xf32, #tpu.memory_space<vmem>>) attributes {dimension_semantics = [#tpu.dimension_semantics<parallel>], iteration_bounds = array<i64: 1>, scalar_prefetch = 0 : i64, scratch_operands = 0 : i64, tpu.core_type = #tpu.core_type<tc>, window_params = [{transform_indices = @transform_0, window_bounds = array<i64: 16, 32>}, {pipeline_mode = #tpu.pipeline_mode<synchronous>, transform_indices = @transform_1, window_bounds = array<i64: 1, 32>}, {pipeline_mode = #tpu.pipeline_mode<synchronous>, transform_indices = @transform_2, window_bounds = array<i64: 1, 32>}, {pipeline_mode = #tpu.pipeline_mode<synchronous>, transform_indices = @transform_3, window_bounds = array<i64: 32, 32>}, {pipeline_mode = #tpu.pipeline_mode<synchronous>, transform_indices = @transform_4, window_bounds = array<i64: 1, 32>}, {transform_indices = @transform_5, window_bounds = array<i64: 16, 32>}]} {
    %c0 = arith.constant 0 : index
    %c0_0 = arith.constant 0 : index
    %0 = vector.load %arg1[%c0, %c0_0] : memref<16x32xf32, #tpu.memory_space<vmem>>, vector<16x32xf32>
    %cst = arith.constant dense<0.000000e+00> : vector<16xf32>
    %1 = vector.multi_reduction <add>, %0, %cst [1] : vector<16x32xf32> to vector<16xf32>
    %2 = vector.shape_cast %1 : vector<16xf32> to vector<16x1xf32>
    %cst_1 = arith.constant 3.200000e+01 : f32
    %3 = vector.broadcast %cst_1 : f32 to vector<16x1xf32>
    %4 = arith.divf %2, %3 : vector<16x1xf32>
    %5 = arith.mulf %0, %0 : vector<16x32xf32>
    %cst_2 = arith.constant dense<0.000000e+00> : vector<16xf32>
    %6 = vector.multi_reduction <add>, %5, %cst_2 [1] : vector<16x32xf32> to vector<16xf32>
    %7 = vector.shape_cast %6 : vector<16xf32> to vector<16x1xf32>
    %cst_3 = arith.constant 3.200000e+01 : f32
    %8 = vector.broadcast %cst_3 : f32 to vector<16x1xf32>
    %9 = arith.divf %7, %8 : vector<16x1xf32>
    %10 = arith.mulf %4, %4 : vector<16x1xf32>
    %11 = arith.subf %9, %10 : vector<16x1xf32>
    %12 = vector.broadcast %4 : vector<16x1xf32> to vector<16x32xf32>
    %13 = arith.subf %0, %12 : vector<16x32xf32>
    %cst_4 = arith.constant 9.99999974E-6 : f32
    %14 = vector.broadcast %cst_4 : f32 to vector<16x1xf32>
    %15 = arith.addf %11, %14 : vector<16x1xf32>
    %16 = math.rsqrt %15 : vector<16x1xf32>
    %17 = vector.broadcast %16 : vector<16x1xf32> to vector<16x32xf32>
    %18 = arith.mulf %13, %17 : vector<16x32xf32>
    %c0_5 = arith.constant 0 : index
    %c0_6 = arith.constant 0 : index
    %19 = vector.load %arg2[%c0_5, %c0_6] : memref<1x32xf32, #tpu.memory_space<vmem>>, vector<1x32xf32>
    %20 = vector.broadcast %19 : vector<1x32xf32> to vector<16x32xf32>
    %21 = arith.mulf %18, %20 : vector<16x32xf32>
    %c0_7 = arith.constant 0 : index
    %c0_8 = arith.constant 0 : index
    %22 = vector.load %arg3[%c0_7, %c0_8] : memref<1x32xf32, #tpu.memory_space<vmem>>, vector<1x32xf32>
    %23 = vector.broadcast %22 : vector<1x32xf32> to vector<16x32xf32>
    %24 = arith.addf %21, %23 : vector<16x32xf32>
    %c0_9 = arith.constant 0 : index
    %c0_10 = arith.constant 0 : index
    %25 = vector.load %arg4[%c0_9, %c0_10] : memref<32x32xf32, #tpu.memory_space<vmem>>, vector<32x32xf32>
    %cst_11 = arith.constant dense<0.000000e+00> : vector<16x32xf32>
    %26 = tpu.matmul %24, %25, %cst_11 {dimension_numbers = #tpu.dot_dimension_numbers<[1], [1], [0], [0], [0, 0, 1, 0], [], []>} : vector<16x32xf32>, vector<32x32xf32>, vector<16x32xf32> -> vector<16x32xf32>
    %c0_12 = arith.constant 0 : index
    %c0_13 = arith.constant 0 : index
    %27 = vector.load %arg5[%c0_12, %c0_13] : memref<1x32xf32, #tpu.memory_space<vmem>>, vector<1x32xf32>
    %28 = vector.broadcast %27 : vector<1x32xf32> to vector<16x32xf32>
    %29 = arith.addf %26, %28 : vector<16x32xf32>
    %c0_14 = arith.constant 0 : index
    %c0_15 = arith.constant 0 : index
    %30 = vector.load %arg6[%c0_14, %c0_15] : memref<16x32xf32, #tpu.memory_space<vmem>>, vector<16x32xf32>
    tpu.vector_store %arg6[%c0_14, %c0_15], %29 {strides = array<i32>} : memref<16x32xf32, #tpu.memory_space<vmem>>, vector<16x32xf32>,
    return
  }
  func.func @transform_0(%arg0: i32) -> (i32, i32) {
    %c0_i32 = arith.constant 0 : i32
    %c0_i32_0 = arith.constant 0 : i32
    return %arg0, %c0_i32 : i32, i32
  }
  func.func @transform_1(%arg0: i32) -> (i32, i32) {
    %c0_i32 = arith.constant 0 : i32
    %c0_i32_0 = arith.constant 0 : i32
    %c0_i32_1 = arith.constant 0 : i32
    return %c0_i32, %c0_i32_0 : i32, i32
  }
  func.func @transform_2(%arg0: i32) -> (i32, i32) {
    %c0_i32 = arith.constant 0 : i32
    %c0_i32_0 = arith.constant 0 : i32
    %c0_i32_1 = arith.constant 0 : i32
    return %c0_i32, %c0_i32_0 : i32, i32
  }
  func.func @transform_3(%arg0: i32) -> (i32, i32) {
    %c0_i32 = arith.constant 0 : i32
    %c0_i32_0 = arith.constant 0 : i32
    %c0_i32_1 = arith.constant 0 : i32
    return %c0_i32, %c0_i32_0 : i32, i32
  }
  func.func @transform_4(%arg0: i32) -> (i32, i32) {
    %c0_i32 = arith.constant 0 : i32
    %c0_i32_0 = arith.constant 0 : i32
    %c0_i32_1 = arith.constant 0 : i32
    return %c0_i32, %c0_i32_0 : i32, i32
  }
  func.func @transform_5(%arg0: i32) -> (i32, i32) {
    %c0_i32 = arith.constant 0 : i32
    %c0_i32_0 = arith.constant 0 : i32
    return %arg0, %c0_i32 : i32, i32
  }
}

</mosaic_0001>

<bundles_post_ra>
// kernel: tpu_custom_call.1
= control target key start
LH: loop header
LB: loop body
LE: loop exit
PB: predicated region body
PF: predicated region fallthrough
CT: control target
= control target key end

     0   :  { %10 = vsyncpa [#allocation3], 0  ;;  %s404_s0 = inlined_call_operand.hbm [shape: f32[16,32], index: 0, kind: input, shape index: {}]   ;;  %s405_s1 = inlined_call_operand.vmem [shape: f32[1,32], index: 1, kind: input, shape index: {}]   ;;  %s406_s2 = inlined_call_operand.vmem [shape: f32[1,32], index: 2, kind: input, shape index: {}]   ;;  %s407_s3 = inlined_call_operand.hbm [shape: f32[32,32], index: 3, kind: input, shape index: {}]   ;;  %s408_s4 = inlined_call_operand.vmem [shape: f32[1,32], index: 4, kind: input, shape index: {}]   ;;  %s409_s5 = inlined_call_operand.hbm [shape: f32[16,32], index: 5, kind: output, shape index: {}]  }
   0x1   :  { %11 = vsyncpa [#allocation6], 0 }
   0x2   :  { %12 = vsyncpa [#allocation4], 0  ;;  %s326_s18 = smov [#allocation2]  }
   0x3   :  { %s18_s19 = sshll.u32 %s326_s18, 4  ;;  %s19_s19 = int_to_ptr.vmem [resolvable:$true] %s18_s19 }
   0x4   :  { %s268_s20 = scalar_lea.vmem %s19_s19, 256  ;;  %p273_p1 = scmp.lt.s32.totalorder %s19_s19, %s19_s19 }
   0x5   :  { %p269_p0 = scmp.ne.s32.totalorder %s19_s19, %s268_s20  ;;  %p274_p2 = scmp.lt.s32.totalorder %s268_s20, %s268_s20 }
   0x7   :  { %p275_p3 = por %p274_p2, %p273_p1 }
   0x9   :  { %p276_p4 = pnand %p275_p3, %p269_p0 }
   0xb   :  { %279 = shalt.err (!%p276_p4)
}
   0xc   :  { %s327_s21 = smov 128   ;;  %s328_s22 = smov 8  }
   0xd   :  { %24 = dma.hbm_to_vmem [thread:$0]  %s404_s0, 256, %s19_s19, [#allocation3], %s327_s21, %s327_s21, %s328_s22  }
   0xe   :  { %s329_s25 = smov [#allocation5]  }
   0xf   :  { %s34_s26 = sshll.u32 %s329_s25, 4  ;;  %s35_s26 = int_to_ptr.vmem [resolvable:$true] %s34_s26 }
  0x10   :  { %s288_s27 = scalar_lea.vmem %s35_s26, 512  ;;  %p293_p6 = scmp.lt.s32.totalorder %s35_s26, %s35_s26 }
  0x11   :  { %p289_p5 = scmp.ne.s32.totalorder %s35_s26, %s288_s27  ;;  %p294_p7 = scmp.lt.s32.totalorder %s288_s27, %s288_s27 }
  0x13   :  { %p295_p8 = por %p294_p7, %p293_p6 }
  0x15   :  { %p296_p9 = pnand %p295_p8, %p289_p5 }
  0x17   :  { %299 = shalt.err (!%p296_p9)
}
  0x18   :  { %40 = dma.hbm_to_vmem [thread:$0]  %s407_s3, 512, %s35_s26, [#allocation6], %s327_s21, %s327_s21, %s328_s22  }
  0x19   :  { %320 = dma.done.wait [#allocation3], 256  }
  0x1a   :  { %321 = vsyncadd [#allocation3], 4294967040 }
  0x1b   :  { %322 = dma.done.wait [#allocation6], 512  }
  0x1c   :  { %323 = vsyncadd [#allocation6], 4294966784  ;;  %vm51_vm0 = vcmask 261120   ;;  %v49_v0 = vld [vmem:[#allocation2] sm:$0xff]  ;;  %v50_v1 = vld [vmem:[#allocation2 + $0x8] sm:$0xff] }
  0x1d   :  { %v52_v2 = vsel %vm51_vm0, %v49_v0, 0.0  ;;  %v61_v3 = vmul.f32 %v49_v0, %v49_v0  ;;  %v62_v4 = vmul.f32 %v50_v1, %v50_v1  ;;  %v55_v6 = vsel %vm51_vm0, %v50_v1, 0.0  ;;  %v104_v8 = vld [vmem:[#allocation5 + $0x18] sm:$0xff]  ;;  %v103_v9 = vld [vmem:[#allocation5 + $0x10] sm:$0xff]  ;;  %v102_v10 = vld [vmem:[#allocation5 + $0x8] sm:$0xff] }
  0x1e   :  { %53 = vadd.xlane.f32.xlu0 %v52_v2  ;;  %240 = vmatprep.subr.msk.mxu0 %vm51_vm0, %v104_v8  ;;  %v101_v11 = vld [vmem:[#allocation5] sm:$0xff]  ;;  %v225_v28 = vld [vmem:[%s405_s1] ss:$0 sm:$0xff]  ;;  %s330_s1 = smov [#allocation7]  }
  0x1f   :  { %v63_v5 = vsel %vm51_vm0, %v61_v3, 0.0  ;;  %v66_v7 = vsel %vm51_vm0, %v62_v4, 0.0  ;;  %241 = vmatpush3.xpose.msk.msra.mxu0 %vm51_vm0, %v104_v8  ;;  %v226_v30 = vld [vmem:[%s406_s2] ss:$0 sm:$0xff]  ;;  %s212_s9 = sshll.u32 %s330_s1, 4  ;;  %s213_s9 = int_to_ptr.vmem [resolvable:$true] %s212_s9 }
  0x20   :  { %64 = vadd.xlane.f32.xlu1 %v63_v5  ;;  %242 = vmatprep.subr.msk.mxu0 %vm51_vm0, %v103_v9  ;;  %v227_v38 = vld [vmem:[%s408_s4] ss:$0 sm:$0xff]  ;;  %s300_s2 = scalar_lea.vmem %s213_s9, 256  ;;  %p305_p11 = scmp.lt.s32.totalorder %s213_s9, %s213_s9 }
  0x21   :  { %p301_p10 = scmp.ne.s32.totalorder %s213_s9, %s300_s2  ;;  %p306_p12 = scmp.lt.s32.totalorder %s300_s2, %s300_s2 }
  0x22   :  { %56 = vadd.xlane.f32.xlu0 %v55_v6 }
  0x23   :  { %243 = vmatpush3.xpose.msk.msra.mxu0 %vm51_vm0, %v103_v9  ;;  %p307_p13 = por %p306_p12, %p305_p11 }
  0x24   :  { %67 = vadd.xlane.f32.xlu1 %v66_v7  ;;  %244 = vmatprep.subr.msk.mxu0 %vm51_vm0, %v102_v10 }
  0x25   :  { %p308_p0 = pnand %p307_p13, %p301_p10 }
  0x27   :  { %245 = vmatpush3.xpose.msk.msra.mxu0 %vm51_vm0, %v102_v10 }
  0x28   :  { %246 = vmatprep.subr.msk.mxu0 %vm51_vm0, %v101_v11 }
  0x2b   :  { %247 = vmatpush3.xpose.msk.msra.mxu0 %vm51_vm0, %v101_v11 }
  0xa7   :  { %v54_v12 = vpop.xlane.xlu0 %53 }
  0xa8   :  { %v59_v13 = vmul.f32 0.03125, %v54_v12 }
  0xa9   :  { %v65_v14 = vpop.xlane.xlu1 %64 }
  0xaa   :  { %v71_v15 = vmul.f32 %v59_v13, %v59_v13  ;;  %v69_v16 = vmul.f32 0.03125, %v65_v14  ;;  %v75_v26 = vsub.f32 %v49_v0, %v59_v13 }
  0xab   :  { %v57_v17 = vpop.xlane.xlu0 %56 }
  0xac   :  { %v73_v18 = vsub.f32 %v69_v16, %v71_v15  ;;  %v60_v19 = vmul.f32 0.03125, %v57_v17 }
  0xad   :  { %v68_v20 = vpop.xlane.xlu1 %67 }
  0xae   :  { %v77_v21 = vadd.f32 1e-05, %v73_v18  ;;  %v72_v22 = vmul.f32 %v60_v19, %v60_v19  ;;  %v70_v23 = vmul.f32 0.03125, %v68_v20  ;;  %v76_v31 = vsub.f32 %v50_v1, %v60_v19 }
  0xb0   :  { %256 = vrsqrt.f32 %v77_v21  ;;  %v74_v24 = vsub.f32 %v70_v23, %v72_v22 }
  0xb2   :  { %v78_v25 = vadd.f32 1e-05, %v74_v24 }
  0xb4   :  { %258 = vrsqrt.f32 %v78_v25 }
  0xbd   :  { %v257_v27 = vpop.eup %256 }
  0xbe   :  { %v81_v29 = vmul.f32 %v257_v27, %v75_v26 }
  0xc0   :  { %v90_v32 = vmul.f32 %v225_v28, %v81_v29 }
  0xc1   :  { %v259_v33 = vpop.eup %258 }
  0xc2   :  { %v82_v34 = vmul.f32 %v259_v33, %v76_v31  ;;  %v99_v35 = vadd.f32 %v226_v30, %v90_v32 }
  0xc4   :  { %v91_v36 = vmul.f32 %v225_v28, %v82_v34  ;;  %248 = vmatprep.mubr.msk.f32.mxu0 %vm51_vm0, %v99_v35 }
  0xc6   :  { %v100_v37 = vadd.f32 %v226_v30, %v91_v36 }
  0xc8   :  { %249 = vmatmul.mubr.msk.f32.vlgmr.msra.gmra.mxu0 %vm51_vm0, %v100_v37 }
 0x188   :  { %v250_v39 = vpop.f32.mrf.mxu0 }
 0x189   :  { %v202_v40 = vadd.f32 %v250_v39, %v227_v38 }
 0x18a   :  { %v196_v41 = vpop.f32.mrf.mxu0 }
 0x18b   :  { %206 = vst.msk [vmem:[#allocation7 + $0x8] sm:$0xff] %vm51_vm0, %v202_v40  ;;  %v197_v42 = vadd.f32 %v227_v38, %v196_v41 }
 0x18d   :  { %205 = vst.msk [vmem:[#allocation7] sm:$0xff] %vm51_vm0, %v197_v42 }
 0x18e   :  { %311 = shalt.err (!%p308_p0)
}
 0x18f   :  { %218 = dma.vmem_to_hbm [thread:$0]  %s213_s9, 256, %s409_s5, [#allocation4], %s327_s21, %s327_s21, %s328_s22  }
 0x190   :  { %324 = dma.done.wait [#allocation4], 256  }
 0x191   :  { %325 = vsyncadd [#allocation4], 4294967040 }
 0x192   :  { %222 = vsyncpa [#allocation3], 1 }
 0x193   :  { %223 = vsyncpa [#allocation6], 1 }
 0x194   :  { %224 = vsyncpa [#allocation4], 1 }

</bundles_post_ra>
